<compile_context>
chip_gen: v6e
topology: v6e:2x2x1
jax: 0.10.0
libtpu: 0.0.40
codegen_flags: <defaults>
</compile_context>

<pallas_src>
import math

import jax
import jax.numpy as jnp
from jax import lax
from jax.experimental import pallas as pl
from jax.experimental.pallas import tpu as pltpu

LANES = 128
ACC_ROWS = 8          # one f32 vreg worth of accumulator rows
TR_DEFAULT = 2048     # rows of 128 lanes per tile (1 MiB f32 per block)


def _num_tensorcores():
    """Best-effort #TensorCores per chip (2 on v7x, 1 on v5e/v6e).

    Falls back to 2: on single-TC chips a size-2 'parallel' leading axis only
    costs one mostly-guarded-off extra grid pass + the wrapper row-sum.
    """
    try:
        info = pltpu.get_tpu_info()
        for attr in ("num_cores", "num_tensorcores", "tensorcore_count",
                     "cores_per_chip", "num_cores_per_chip"):
            v = getattr(info, attr, None)
            if isinstance(v, int) and 1 <= v <= 8:
                return v
    except Exception:
        pass
    return 2


def _sublane_align(dtype):
    """Sublane packing granularity: 8 for 4-byte, 16 for 2-byte, 32 for 1-byte."""
    itemsize = jnp.dtype(dtype).itemsize
    return 8 * max(1, 4 // max(1, itemsize))


def _lane_view(x, pad_value):
    """(rows, 128) lane-dense view of x's data. Free reshape when numel%128==0."""
    n = x.size
    rem = n % LANES
    if rem == 0:
        return x.reshape(-1, LANES)
    # TODO(synk): rare ragged-size case; this materializes one copy of `x`.
    flat = x.reshape(-1)
    flat = jnp.concatenate(
        [flat, jnp.full((LANES - rem,), pad_value, dtype=flat.dtype)])
    return flat.reshape(-1, LANES)


def _tiling(arr2d, tile_rows):
    """Per-tensor (rows, block_rows, num_tiles) with dtype-aware alignment."""
    rows = arr2d.shape[0]
    s = _sublane_align(arr2d.dtype)
    if rows <= tile_rows:
        tr = rows                          # full-dim block: always legal
    else:
        tr = max((tile_rows // s) * s, s)  # sublane-packing-aligned tile
    return rows, tr, pl.cdiv(rows, tr)


def rate_distortion_loss(output, target, lmbda=0.01, gamma=0.006,
                         return_type='all', tile_rows=TR_DEFAULT,
                         num_cores=None):
    """JAX/Pallas equivalent of RateDistortionLoss.forward (metric='mse')."""
    N, _, H, W = target.shape
    num_pixels = N * H * W

    x_hat = output['x_hat']
    feature = output['feature']
    feature_target = output['feature_target']
    lik_list = list(output['likelihoods'].values())
    n_lik = len(lik_list)

    num_cores = _num_tensorcores() if num_cores is None else int(num_cores)

    # Lane-dense 2D views (no copy / no dtype change in the common case).
    xh2 = _lane_view(x_hat, 0)
    tg2 = _lane_view(target, 0)
    ft2 = _lane_view(feature, 0)
    ftg2 = _lane_view(feature_target, 0)
    lik2 = [_lane_view(l, 1) for l in lik_list]   # log(1)=0 is neutral padding

    rx, trx, tx = _tiling(xh2, tile_rows)
    rf, trf, tf = _tiling(ft2, tile_rows)
    lik_meta = [_tiling(l, tile_rows) for l in lik2]

    t_total = max([tx, tf] + [m[2] for m in lik_meta])
    t_core = pl.cdiv(t_total, num_cores)

    # Static scalar constants baked into the kernel.
    bpp_scale = 1.0 / (-math.log(2.0) * float(num_pixels))
    inv_nx = 1.0 / float(x_hat.size)
    inv_nf = 1.0 / float(feature.size)
    c255 = 255.0 ** 2

    def kernel(*args):
        n_in = 4 + n_lik
        xh_ref, tg_ref, ft_ref, ftg_ref = args[:4]
        lik_refs = args[4:n_in]
        out_ref = args[n_in]
        acc_x, acc_f, acc_lik = args[n_in + 1], args[n_in + 2], args[n_in + 3]

        c = pl.program_id(0)
        i = pl.program_id(1)
        g = c * t_core + i           # global tile index handled by this core

        @pl.when(i == 0)
        def _init():
            acc_x[...] = jnp.zeros_like(acc_x)
            acc_f[...] = jnp.zeros_like(acc_f)
            acc_lik[...] = jnp.zeros_like(acc_lik)

        def add_rows(acc_ref, v, tr):
            # acc_ref[(8,128)] += row-group reduction of v[(tr,128)].
            # Pure cross-vreg VPU adds; only tiny odd-row tensors hit the
            # masked sub-vreg remainder path.
            main = (tr // ACC_ROWS) * ACC_ROWS
            if main > 0:
                vm = v[:main]
                if main > ACC_ROWS:
                    vm = jnp.sum(vm.reshape(main // ACC_ROWS, ACC_ROWS, LANES),
                                 axis=0)
                acc_ref[...] += vm
            rem = tr - main
            if rem > 0:
                acc_ref[0:rem, :] += v[main:]

        def accum(acc_ref, rows, tr, tiles, make_val):
            ragged = (tiles * tr != rows)
            full_tiles = tiles - 1 if ragged else tiles

            @pl.when(g < full_tiles)           # steady state: unmasked VPU work
            def _():
                add_rows(acc_ref, make_val(None), tr)

            if ragged:                         # only the very last tile is masked
                @pl.when(g == tiles - 1)
                def _():
                    row_ids = ((tiles - 1) * tr
                               + lax.broadcasted_iota(jnp.int32, (tr, LANES), 0))
                    add_rows(acc_ref, make_val(row_ids < rows), tr)

        def mse_val(a_ref, b_ref):
            def f(valid):
                d = a_ref[...].astype(jnp.float32) - b_ref[...].astype(jnp.float32)
                if valid is not None:          # mask operand, not result
                    d = jnp.where(valid, d, 0.0)
                return d * d
            return f

        def log_val(l_ref):
            def f(valid):
                l = l_ref[...].astype(jnp.float32)
                if valid is not None:          # mask BEFORE log: no NaN/Inf ever
                    l = jnp.where(valid, l, 1.0)
                return jnp.log(l)              # EUP slot; hidden under DMA
            return f

        accum(acc_x, rx, trx, tx, mse_val(xh_ref, tg_ref))
        accum(acc_f, rf, trf, tf, mse_val(ft_ref, ftg_ref))
        for l_ref, (r, tr, t) in zip(lik_refs, lik_meta):
            accum(acc_lik, r, tr, t, log_val(l_ref))   # merged accumulator

        @pl.when(i == t_core - 1)
        def _finalize():
            sse_x = jnp.sum(acc_x[...])
            sse_f = jnp.sum(acc_f[...])
            log_sum = jnp.sum(acc_lik[...])
            bpp = log_sum * bpp_scale
            mse = sse_x * inv_nx
            fmse = sse_f * inv_nf
            loss = lmbda * (gamma * c255 * fmse + c255 * mse) + bpp
            lane = lax.broadcasted_iota(jnp.int32, (1, LANES), 1)
            packed = jnp.where(lane == 0, loss,
                      jnp.where(lane == 1, bpp,
                       jnp.where(lane == 2, mse,
                        jnp.where(lane == 3, fmse, 0.0))))
            out_ref[...] = packed.astype(jnp.float32)

    def clamp_map(tiles):
        # Clamp to the last valid block: once a tensor is exhausted the block
        # index stops changing, so Pallas skips its DMA on later steps.
        return lambda c, i: (jnp.minimum(c * t_core + i, tiles - 1), 0)

    in_specs = [
        pl.BlockSpec((trx, LANES), clamp_map(tx)),
        pl.BlockSpec((trx, LANES), clamp_map(tx)),
        pl.BlockSpec((trf, LANES), clamp_map(tf)),
        pl.BlockSpec((trf, LANES), clamp_map(tf)),
    ] + [pl.BlockSpec((m[1], LANES), clamp_map(m[2])) for m in lik_meta]

    out_specs = pl.BlockSpec((None, 1, LANES), lambda c, i: (c, 0, 0))
    out_shape = jax.ShapeDtypeStruct((num_cores, 1, LANES), jnp.float32)

    scratch_shapes = [
        pltpu.VMEM((ACC_ROWS, LANES), jnp.float32),   # acc_x
        pltpu.VMEM((ACC_ROWS, LANES), jnp.float32),   # acc_f
        pltpu.VMEM((ACC_ROWS, LANES), jnp.float32),   # acc_lik (merged)
    ]

    partial_rows = pl.pallas_call(
        kernel,
        grid=(num_cores, t_core),
        in_specs=in_specs,
        out_specs=out_specs,
        out_shape=out_shape,
        scratch_shapes=scratch_shapes,
        compiler_params=pltpu.CompilerParams(
            dimension_semantics=("parallel", "arbitrary"),
            vmem_limit_bytes=48 * 1024 * 1024),
    )(xh2, tg2, ft2, ftg2, *lik2)

    # The loss terms are linear in the per-core partial sums -> just add rows.
    packed = jnp.sum(partial_rows, axis=0)[0]   # (128,)
    out = {
        'loss': packed[0],
        'bpp_loss': packed[1],
        'mse_loss': packed[2],
        'feature_mse_loss': packed[3],
    }
    if return_type == 'all':
        return out
    return out[return_type]


if __name__ == "__main__":
    key = jax.random.PRNGKey(0)
    k1, k2, k3, k4, k5, k6 = jax.random.split(key, 6)

    # Small shapes consistent with the forward pass (NCHW); all numel % 128 == 0
    # so the lane-dense views are free (no host padding copies).
    N, C, H, W = 2, 4, 16, 16
    FC, FH, FW = 40, 8, 8            # feature map (40 rows -> exercises ragged tile)
    target = jax.random.uniform(k1, (N, C, H, W), jnp.float32)
    x_hat = jnp.clip(
        target + 0.05 * jax.random.normal(k2, (N, C, H, W), jnp.float32),
        0.0, 1.0)
    feature = jax.random.normal(k3, (N, FC, FH, FW), jnp.float32)
    feature_target = feature + 0.1 * jax.random.normal(
        k4, (N, FC, FH, FW), jnp.float32)
    lik_y = jax.random.uniform(k5, (N, 8, 4, 4), jnp.float32,
                               minval=1e-3, maxval=1.0)
    lik_z = jax.random.uniform(k6, (N, 4, 4, 4), jnp.float32,
                               minval=1e-3, maxval=1.0)

    output = {
        'x_hat': x_hat,
        'feature': feature,
        'feature_target': feature_target,
        'likelihoods': {'y': lik_y, 'z': lik_z},
    }

    lmbda, gamma = 0.01, 0.006

    # Pure-JAX reference.
    ref_bpp = ((jnp.sum(jnp.log(lik_y)) + jnp.sum(jnp.log(lik_z)))
               / (-math.log(2.0) * (N * H * W)))
    ref_fmse = jnp.mean((feature - feature_target) ** 2)
    ref_mse = jnp.mean((x_hat - target) ** 2)
    ref_loss = lmbda * (gamma * 255.0 ** 2 * ref_fmse
                        + 255.0 ** 2 * ref_mse) + ref_bpp

    # Run twice: small tiles (multi-tile reduction + ragged-tile mask + multi-
    # core split) and the production tile size (everything resident in one tile).
    for tr in (16, TR_DEFAULT):
        res = rate_distortion_loss(output, target, lmbda=lmbda, gamma=gamma,
                                   tile_rows=tr)
        res = jax.block_until_ready(res)
        assert jnp.allclose(res['bpp_loss'], ref_bpp, rtol=1e-5, atol=1e-5)
        assert jnp.allclose(res['feature_mse_loss'], ref_fmse, rtol=1e-5, atol=1e-5)
        assert jnp.allclose(res['mse_loss'], ref_mse, rtol=1e-5, atol=1e-5)
        assert jnp.allclose(res['loss'], ref_loss, rtol=1e-5, atol=1e-5)

    print("KERNEL_OK")
</pallas_src>

<mosaic_0001>
module attributes {stable_mosaic.version = 11 : i64} {
  func.func @kernel(%arg0: i32, %arg1: i32, %arg2: memref<16x128xf32, #tpu.memory_space<vmem>>, %arg3: memref<16x128xf32, #tpu.memory_space<vmem>>, %arg4: memref<16x128xf32, #tpu.memory_space<vmem>>, %arg5: memref<16x128xf32, #tpu.memory_space<vmem>>, %arg6: memref<2x128xf32, #tpu.memory_space<vmem>>, %arg7: memref<1x128xf32, #tpu.memory_space<vmem>>, %arg8: memref<1x1x128xf32, #tpu.memory_space<vmem>>, %arg9: memref<8x128xf32, #tpu.memory_space<vmem>>, %arg10: memref<8x128xf32, #tpu.memory_space<vmem>>, %arg11: memref<8x128xf32, #tpu.memory_space<vmem>>) attributes {dimension_semantics = [#tpu.dimension_semantics<parallel>, #tpu.dimension_semantics<arbitrary>], iteration_bounds = array<i64: 2, 2>, scalar_prefetch = 0 : i64, scratch_operands = 3 : i64, tpu.core_type = #tpu.core_type<tc>, window_params = [{transform_indices = @transform_0, window_bounds = array<i64: 16, 128>}, {transform_indices = @transform_1, window_bounds = array<i64: 16, 128>}, {transform_indices = @transform_2, window_bounds = array<i64: 16, 128>}, {transform_indices = @transform_3, window_bounds = array<i64: 16, 128>}, {transform_indices = @transform_4, window_bounds = array<i64: 2, 128>}, {transform_indices = @transform_5, window_bounds = array<i64: 1, 128>}, {transform_indices = @transform_6, window_bounds = array<i64: 1, 1, 128>}]} {
    %c2_i32 = arith.constant 2 : i32
    %0 = arith.muli %arg0, %c2_i32 : i32
    %1 = arith.addi %0, %arg1 : i32
    %c0_i32 = arith.constant 0 : i32
    %2 = arith.cmpi eq, %arg1, %c0_i32 : i32
    %3 = arith.extui %2 : i1 to i32
    %c0_i32_0 = arith.constant 0 : i32
    %4 = arith.cmpi ne, %3, %c0_i32_0 : i32
    scf.if %4 {
      %cst = arith.constant 0.000000e+00 : f32
      %23 = vector.broadcast %cst : f32 to vector<8x128xf32>
      %c0 = arith.constant 0 : index
      %c0_12 = arith.constant 0 : index
      %24 = vector.load %arg9[%c0, %c0_12] : memref<8x128xf32, #tpu.memory_space<vmem>>, vector<8x128xf32>
      tpu.vector_store %arg9[%c0, %c0_12], %23 {strides = array<i32>} : memref<8x128xf32, #tpu.memory_space<vmem>>, vector<8x128xf32>,
      %cst_13 = arith.constant 0.000000e+00 : f32
      %25 = vector.broadcast %cst_13 : f32 to vector<8x128xf32>
      %c0_14 = arith.constant 0 : index
      %c0_15 = arith.constant 0 : index
      %26 = vector.load %arg10[%c0_14, %c0_15] : memref<8x128xf32, #tpu.memory_space<vmem>>, vector<8x128xf32>
      tpu.vector_store %arg10[%c0_14, %c0_15], %25 {strides = array<i32>} : memref<8x128xf32, #tpu.memory_space<vmem>>, vector<8x128xf32>,
      %cst_16 = arith.constant 0.000000e+00 : f32
      %27 = vector.broadcast %cst_16 : f32 to vector<8x128xf32>
      %c0_17 = arith.constant 0 : index
      %c0_18 = arith.constant 0 : index
      %28 = vector.load %arg11[%c0_17, %c0_18] : memref<8x128xf32, #tpu.memory_space<vmem>>, vector<8x128xf32>
      tpu.vector_store %arg11[%c0_17, %c0_18], %27 {strides = array<i32>} : memref<8x128xf32, #tpu.memory_space<vmem>>, vector<8x128xf32>,
    } else {
    }
    %c1_i32 = arith.constant 1 : i32
    %5 = arith.cmpi slt, %1, %c1_i32 : i32
    %6 = arith.extui %5 : i1 to i32
    %c0_i32_1 = arith.constant 0 : i32
    %7 = arith.cmpi ne, %6, %c0_i32_1 : i32
    scf.if %7 {
      %c0 = arith.constant 0 : index
      %c0_12 = arith.constant 0 : index
      %23 = vector.load %arg2[%c0, %c0_12] : memref<16x128xf32, #tpu.memory_space<vmem>>, vector<16x128xf32>
      %c0_13 = arith.constant 0 : index
      %c0_14 = arith.constant 0 : index
      %24 = vector.load %arg3[%c0_13, %c0_14] : memref<16x128xf32, #tpu.memory_space<vmem>>, vector<16x128xf32>
      %25 = arith.subf %23, %24 : vector<16x128xf32>
      %26 = arith.mulf %25, %25 : vector<16x128xf32>
      %27 = vector.shape_cast %26 : vector<16x128xf32> to vector<2x8x128xf32>
      %cst = arith.constant dense<0.000000e+00> : vector<8x128xf32>
      %28 = vector.multi_reduction <add>, %27, %cst [0] : vector<2x8x128xf32> to vector<8x128xf32>
      %c0_15 = arith.constant 0 : index
      %c0_16 = arith.constant 0 : index
      %29 = vector.load %arg9[%c0_15, %c0_16] : memref<8x128xf32, #tpu.memory_space<vmem>>, vector<8x128xf32>
      %30 = arith.addf %29, %28 : vector<8x128xf32>
      %c0_17 = arith.constant 0 : index
      %c0_18 = arith.constant 0 : index
      %31 = vector.load %arg9[%c0_17, %c0_18] : memref<8x128xf32, #tpu.memory_space<vmem>>, vector<8x128xf32>
      tpu.vector_store %arg9[%c0_17, %c0_18], %30 {strides = array<i32>} : memref<8x128xf32, #tpu.memory_space<vmem>>, vector<8x128xf32>,
    } else {
    }
    %c2_i32_2 = arith.constant 2 : i32
    %8 = arith.cmpi slt, %1, %c2_i32_2 : i32
    %9 = arith.extui %8 : i1 to i32
    %c0_i32_3 = arith.constant 0 : i32
    %10 = arith.cmpi ne, %9, %c0_i32_3 : i32
    scf.if %10 {
      %c0 = arith.constant 0 : index
      %c0_12 = arith.constant 0 : index
      %23 = vector.load %arg4[%c0, %c0_12] : memref<16x128xf32, #tpu.memory_space<vmem>>, vector<16x128xf32>
      %c0_13 = arith.constant 0 : index
      %c0_14 = arith.constant 0 : index
      %24 = vector.load %arg5[%c0_13, %c0_14] : memref<16x128xf32, #tpu.memory_space<vmem>>, vector<16x128xf32>
      %25 = arith.subf %23, %24 : vector<16x128xf32>
      %26 = arith.mulf %25, %25 : vector<16x128xf32>
      %27 = vector.shape_cast %26 : vector<16x128xf32> to vector<2x8x128xf32>
      %cst = arith.constant dense<0.000000e+00> : vector<8x128xf32>
      %28 = vector.multi_reduction <add>, %27, %cst [0] : vector<2x8x128xf32> to vector<8x128xf32>
      %c0_15 = arith.constant 0 : index
      %c0_16 = arith.constant 0 : index
      %29 = vector.load %arg10[%c0_15, %c0_16] : memref<8x128xf32, #tpu.memory_space<vmem>>, vector<8x128xf32>
      %30 = arith.addf %29, %28 : vector<8x128xf32>
      %c0_17 = arith.constant 0 : index
      %c0_18 = arith.constant 0 : index
      %31 = vector.load %arg10[%c0_17, %c0_18] : memref<8x128xf32, #tpu.memory_space<vmem>>, vector<8x128xf32>
      tpu.vector_store %arg10[%c0_17, %c0_18], %30 {strides = array<i32>} : memref<8x128xf32, #tpu.memory_space<vmem>>, vector<8x128xf32>,
    } else {
    }
    %c2_i32_4 = arith.constant 2 : i32
    %11 = arith.cmpi eq, %1, %c2_i32_4 : i32
    %12 = arith.extui %11 : i1 to i32
    %c0_i32_5 = arith.constant 0 : i32
    %13 = arith.cmpi ne, %12, %c0_i32_5 : i32
    scf.if %13 {
      %23 = tpu.iota {dimensions = array<i32: 0>} : vector<16x128xi32>
      %c32_i32 = arith.constant 32 : i32
      %24 = vector.broadcast %c32_i32 : i32 to vector<16x128xi32>
      %25 = arith.addi %24, %23 : vector<16x128xi32>
      %c40_i32 = arith.constant 40 : i32
      %26 = vector.broadcast %c40_i32 : i32 to vector<16x128xi32>
      %27 = arith.cmpi slt, %25, %26 : vector<16x128xi32>
      %c0 = arith.constant 0 : index
      %c0_12 = arith.constant 0 : index
      %28 = vector.load %arg4[%c0, %c0_12] : memref<16x128xf32, #tpu.memory_space<vmem>>, vector<16x128xf32>
      %c0_13 = arith.constant 0 : index
      %c0_14 = arith.constant 0 : index
      %29 = vector.load %arg5[%c0_13, %c0_14] : memref<16x128xf32, #tpu.memory_space<vmem>>, vector<16x128xf32>
      %30 = arith.subf %28, %29 : vector<16x128xf32>
      %cst = arith.constant 0.000000e+00 : f32
      %31 = vector.broadcast %cst : f32 to vector<16x128xf32>
      %32 = arith.select %27, %30, %31 : vector<16x128xi1>, vector<16x128xf32>
      %33 = arith.mulf %32, %32 : vector<16x128xf32>
      %34 = vector.shape_cast %33 : vector<16x128xf32> to vector<2x8x128xf32>
      %cst_15 = arith.constant dense<0.000000e+00> : vector<8x128xf32>
      %35 = vector.multi_reduction <add>, %34, %cst_15 [0] : vector<2x8x128xf32> to vector<8x128xf32>
      %c0_16 = arith.constant 0 : index
      %c0_17 = arith.constant 0 : index
      %36 = vector.load %arg10[%c0_16, %c0_17] : memref<8x128xf32, #tpu.memory_space<vmem>>, vector<8x128xf32>
      %37 = arith.addf %36, %35 : vector<8x128xf32>
      %c0_18 = arith.constant 0 : index
      %c0_19 = arith.constant 0 : index
      %38 = vector.load %arg10[%c0_18, %c0_19] : memref<8x128xf32, #tpu.memory_space<vmem>>, vector<8x128xf32>
      tpu.vector_store %arg10[%c0_18, %c0_19], %37 {strides = array<i32>} : memref<8x128xf32, #tpu.memory_space<vmem>>, vector<8x128xf32>,
    } else {
    }
    %c1_i32_6 = arith.constant 1 : i32
    %14 = arith.cmpi slt, %1, %c1_i32_6 : i32
    %15 = arith.extui %14 : i1 to i32
    %c0_i32_7 = arith.constant 0 : i32
    %16 = arith.cmpi ne, %15, %c0_i32_7 : i32
    scf.if %16 {
      %c0 = arith.constant 0 : index
      %c0_12 = arith.constant 0 : index
      %23 = vector.load %arg6[%c0, %c0_12] : memref<2x128xf32, #tpu.memory_space<vmem>>, vector<2x128xf32>
      %24 = math.log %23 : vector<2x128xf32>
      %c0_13 = arith.constant 0 : index
      %c0_14 = arith.constant 0 : index
      %25 = vector.load %arg11[%c0_13, %c0_14] : memref<8x128xf32, #tpu.memory_space<vmem>>, vector<2x128xf32>
      %26 = arith.addf %25, %24 : vector<2x128xf32>
      %c0_15 = arith.constant 0 : index
      %c0_16 = arith.constant 0 : index
      %27 = vector.load %arg11[%c0_15, %c0_16] : memref<8x128xf32, #tpu.memory_space<vmem>>, vector<2x128xf32>
      tpu.vector_store %arg11[%c0_15, %c0_16], %26 {strides = array<i32>} : memref<8x128xf32, #tpu.memory_space<vmem>>, vector<2x128xf32>,
    } else {
    }
    %c1_i32_8 = arith.constant 1 : i32
    %17 = arith.cmpi slt, %1, %c1_i32_8 : i32
    %18 = arith.extui %17 : i1 to i32
    %c0_i32_9 = arith.constant 0 : i32
    %19 = arith.cmpi ne, %18, %c0_i32_9 : i32
    scf.if %19 {
      %c0 = arith.constant 0 : index
      %c0_12 = arith.constant 0 : index
      %23 = vector.load %arg7[%c0, %c0_12] : memref<1x128xf32, #tpu.memory_space<vmem>>, vector<1x128xf32>
      %24 = math.log %23 : vector<1x128xf32>
      %c0_13 = arith.constant 0 : index
      %c0_14 = arith.constant 0 : index
      %25 = vector.load %arg11[%c0_13, %c0_14] : memref<8x128xf32, #tpu.memory_space<vmem>>, vector<1x128xf32>
      %26 = arith.addf %25, %24 : vector<1x128xf32>
      %c0_15 = arith.constant 0 : index
      %c0_16 = arith.constant 0 : index
      %27 = vector.load %arg11[%c0_15, %c0_16] : memref<8x128xf32, #tpu.memory_space<vmem>>, vector<1x128xf32>
      tpu.vector_store %arg11[%c0_15, %c0_16], %26 {strides = array<i32>} : memref<8x128xf32, #tpu.memory_space<vmem>>, vector<1x128xf32>,
    } else {
    }
    %c1_i32_10 = arith.constant 1 : i32
    %20 = arith.cmpi eq, %arg1, %c1_i32_10 : i32
    %21 = arith.extui %20 : i1 to i32
    %c0_i32_11 = arith.constant 0 : i32
    %22 = arith.cmpi ne, %21, %c0_i32_11 : i32
    scf.if %22 {
      %c0 = arith.constant 0 : index
      %c0_12 = arith.constant 0 : index
      %23 = vector.load %arg9[%c0, %c0_12] : memref<8x128xf32, #tpu.memory_space<vmem>>, vector<8x128xf32>
      %24 = vector.shape_cast %23 : vector<8x128xf32> to vector<1x8x128xf32>
      %cst = arith.constant dense<0.000000e+00> : vector<1xf32>
      %25 = vector.multi_reduction <add>, %24, %cst [1, 2] : vector<1x8x128xf32> to vector<1xf32>
      %26 = vector.shape_cast %25 : vector<1xf32> to vector<1x1x1xf32>
      %27 = vector.extract %26[0, 0, 0] : f32 from vector<1x1x1xf32>
      %c0_13 = arith.constant 0 : index
      %c0_14 = arith.constant 0 : index
      %28 = vector.load %arg10[%c0_13, %c0_14] : memref<8x128xf32, #tpu.memory_space<vmem>>, vector<8x128xf32>
      %29 = vector.shape_cast %28 : vector<8x128xf32> to vector<1x8x128xf32>
      %cst_15 = arith.constant dense<0.000000e+00> : vector<1xf32>
      %30 = vector.multi_reduction <add>, %29, %cst_15 [1, 2] : vector<1x8x128xf32> to vector<1xf32>
      %31 = vector.shape_cast %30 : vector<1xf32> to vector<1x1x1xf32>
      %32 = vector.extract %31[0, 0, 0] : f32 from vector<1x1x1xf32>
      %c0_16 = arith.constant 0 : index
      %c0_17 = arith.constant 0 : index
      %33 = vector.load %arg11[%c0_16, %c0_17] : memref<8x128xf32, #tpu.memory_space<vmem>>, vector<8x128xf32>
      %34 = vector.shape_cast %33 : vector<8x128xf32> to vector<1x8x128xf32>
      %cst_18 = arith.constant dense<0.000000e+00> : vector<1xf32>
      %35 = vector.multi_reduction <add>, %34, %cst_18 [1, 2] : vector<1x8x128xf32> to vector<1xf32>
      %36 = vector.shape_cast %35 : vector<1xf32> to vector<1x1x1xf32>
      %37 = vector.extract %36[0, 0, 0] : f32 from vector<1x1x1xf32>
      %cst_19 = arith.constant -0.00281776371 : f32
      %38 = arith.mulf %37, %cst_19 : f32
      %cst_20 = arith.constant 4.8828125E-4 : f32
      %39 = arith.mulf %27, %cst_20 : f32
      %cst_21 = arith.constant 1.95312503E-4 : f32
      %40 = arith.mulf %32, %cst_21 : f32
      %cst_22 = arith.constant 3.901500e+02 : f32
      %41 = arith.mulf %cst_22, %40 : f32
      %cst_23 = arith.constant 6.502500e+04 : f32
      %42 = arith.mulf %cst_23, %39 : f32
      %43 = arith.addf %41, %42 : f32
      %cst_24 = arith.constant 0.00999999977 : f32
      %44 = arith.mulf %cst_24, %43 : f32
      %45 = arith.addf %44, %38 : f32
      %46 = tpu.iota {dimensions = array<i32: 1>} : vector<1x128xi32>
      %c0_i32_25 = arith.constant 0 : i32
      %47 = vector.broadcast %c0_i32_25 : i32 to vector<1x128xi32>
      %48 = arith.cmpi eq, %46, %47 : vector<1x128xi32>
      %c1_i32_26 = arith.constant 1 : i32
      %49 = vector.broadcast %c1_i32_26 : i32 to vector<1x128xi32>
      %50 = arith.cmpi eq, %46, %49 : vector<1x128xi32>
      %c2_i32_27 = arith.constant 2 : i32
      %51 = vector.broadcast %c2_i32_27 : i32 to vector<1x128xi32>
      %52 = arith.cmpi eq, %46, %51 : vector<1x128xi32>
      %c3_i32 = arith.constant 3 : i32
      %53 = vector.broadcast %c3_i32 : i32 to vector<1x128xi32>
      %54 = arith.cmpi eq, %46, %53 : vector<1x128xi32>
      %cst_28 = arith.constant 0.000000e+00 : f32
      %55 = vector.broadcast %40 : f32 to vector<1x128xf32>
      %56 = vector.broadcast %cst_28 : f32 to vector<1x128xf32>
      %57 = arith.select %54, %55, %56 : vector<1x128xi1>, vector<1x128xf32>
      %58 = vector.broadcast %39 : f32 to vector<1x128xf32>
      %59 = arith.select %52, %58, %57 : vector<1x128xi1>, vector<1x128xf32>
      %60 = vector.broadcast %38 : f32 to vector<1x128xf32>
      %61 = arith.select %50, %60, %59 : vector<1x128xi1>, vector<1x128xf32>
      %62 = vector.broadcast %45 : f32 to vector<1x128xf32>
      %63 = arith.select %48, %62, %61 : vector<1x128xi1>, vector<1x128xf32>
      %c0_29 = arith.constant 0 : index
      %c0_30 = arith.constant 0 : index
      %c0_31 = arith.constant 0 : index
      %64 = vector.load %arg8[%c0_29, %c0_30, %c0_31] : memref<1x1x128xf32, #tpu.memory_space<vmem>>, vector<1x1x128xf32>
      %65 = vector.shape_cast %64 : vector<1x1x128xf32> to vector<1x128xf32>
      %66 = vector.shape_cast %63 : vector<1x128xf32> to vector<1x1x128xf32>
      tpu.vector_store %arg8[%c0_29, %c0_30, %c0_31], %66 {strides = array<i32>} : memref<1x1x128xf32, #tpu.memory_space<vmem>>, vector<1x1x128xf32>,
    } else {
    }
    return
  }
  func.func @transform_0(%arg0: i32, %arg1: i32) -> (i32, i32) {
    %c2_i32 = arith.constant 2 : i32
    %0 = arith.muli %arg0, %c2_i32 : i32
    %1 = arith.addi %0, %arg1 : i32
    %c0_i32 = arith.constant 0 : i32
    %2 = arith.minsi %1, %c0_i32 : i32
    %c0_i32_0 = arith.constant 0 : i32
    %c0_i32_1 = arith.constant 0 : i32
    return %2, %c0_i32_0 : i32, i32
  }
  func.func @transform_1(%arg0: i32, %arg1: i32) -> (i32, i32) {
    %c2_i32 = arith.constant 2 : i32
    %0 = arith.muli %arg0, %c2_i32 : i32
    %1 = arith.addi %0, %arg1 : i32
    %c0_i32 = arith.constant 0 : i32
    %2 = arith.minsi %1, %c0_i32 : i32
    %c0_i32_0 = arith.constant 0 : i32
    %c0_i32_1 = arith.constant 0 : i32
    return %2, %c0_i32_0 : i32, i32
  }
  func.func @transform_2(%arg0: i32, %arg1: i32) -> (i32, i32) {
    %c2_i32 = arith.constant 2 : i32
    %0 = arith.muli %arg0, %c2_i32 : i32
    %1 = arith.addi %0, %arg1 : i32
    %c2_i32_0 = arith.constant 2 : i32
    %2 = arith.minsi %1, %c2_i32_0 : i32
    %c0_i32 = arith.constant 0 : i32
    %c0_i32_1 = arith.constant 0 : i32
    return %2, %c0_i32 : i32, i32
  }
  func.func @transform_3(%arg0: i32, %arg1: i32) -> (i32, i32) {
    %c2_i32 = arith.constant 2 : i32
    %0 = arith.muli %arg0, %c2_i32 : i32
    %1 = arith.addi %0, %arg1 : i32
    %c2_i32_0 = arith.constant 2 : i32
    %2 = arith.minsi %1, %c2_i32_0 : i32
    %c0_i32 = arith.constant 0 : i32
    %c0_i32_1 = arith.constant 0 : i32
    return %2, %c0_i32 : i32, i32
  }
  func.func @transform_4(%arg0: i32, %arg1: i32) -> (i32, i32) {
    %c2_i32 = arith.constant 2 : i32
    %0 = arith.muli %arg0, %c2_i32 : i32
    %1 = arith.addi %0, %arg1 : i32
    %c0_i32 = arith.constant 0 : i32
    %2 = arith.minsi %1, %c0_i32 : i32
    %c0_i32_0 = arith.constant 0 : i32
    %c0_i32_1 = arith.constant 0 : i32
    return %2, %c0_i32_0 : i32, i32
  }
  func.func @transform_5(%arg0: i32, %arg1: i32) -> (i32, i32) {
    %c2_i32 = arith.constant 2 : i32
    %0 = arith.muli %arg0, %c2_i32 : i32
    %1 = arith.addi %0, %arg1 : i32
    %c0_i32 = arith.constant 0 : i32
    %2 = arith.minsi %1, %c0_i32 : i32
    %c0_i32_0 = arith.constant 0 : i32
    %c0_i32_1 = arith.constant 0 : i32
    return %2, %c0_i32_0 : i32, i32
  }
  func.func @transform_6(%arg0: i32, %arg1: i32) -> (i32, i32, i32) {
    %c0_i32 = arith.constant 0 : i32
    %c0_i32_0 = arith.constant 0 : i32
    %c0_i32_1 = arith.constant 0 : i32
    return %arg0, %c0_i32, %c0_i32_0 : i32, i32, i32
  }
}

</mosaic_0001>

<bundles_post_ra>
// kernel: tpu_custom_call.1
= control target key start
LH: loop header
LB: loop body
LE: loop exit
PB: predicated region body
PF: predicated region fallthrough
CT: control target
= control target key end

     0   :  { %s1802_s0 = inlined_call_operand.hbm [shape: f32[16,128], index: 0, kind: input, shape index: {}]   ;;  %s1803_s1 = inlined_call_operand.hbm [shape: f32[16,128], index: 1, kind: input, shape index: {}]   ;;  %s1804_s2 = inlined_call_operand.hbm [shape: f32[40,128], index: 2, kind: input, shape index: {}]   ;;  %s1805_s3 = inlined_call_operand.hbm [shape: f32[40,128], index: 3, kind: input, shape index: {}]   ;;  %s1806_s4 = inlined_call_operand.vmem [shape: f32[2,128], index: 4, kind: input, shape index: {}]   ;;  %s1807_s5 = inlined_call_operand.vmem [shape: f32[1,128], index: 5, kind: input, shape index: {}]   ;;  %s1808_s6 = inlined_call_operand.hbm [shape: f32[2,1,128], index: 6, kind: output, shape index: {}]  }
   0x1   :  { %1822 = sst [smem:[#allocation29_spill]] %s1806_s4 }
   0x2   :  { %1823 = sst [smem:[#allocation30_spill]] %s1807_s5 }
   0x3   :  { %1824 = sst [smem:[#allocation31_spill]] %s1808_s6 }
   0x4   :  { %11 = vsyncpa [#allocation6], 0 }
   0x5   :  { %13 = vsyncpa [#allocation6 + $0x1], 0 }
   0x6   :  { %14 = vsyncpa [#allocation9], 0 }
   0x7   :  { %16 = vsyncpa [#allocation9 + $0x1], 0 }
   0x8   :  { %17 = vsyncpa [#allocation12], 0 }
   0x9   :  { %19 = vsyncpa [#allocation12 + $0x1], 0 }
   0xa   :  { %20 = vsyncpa [#allocation7], 0 }
   0xb   :  { %22 = vsyncpa [#allocation7 + $0x1], 0  ;;  %s1404_s21 = smov 0   ;;  %s1406_s22 = smov 0  }
   0xc   :  { %s1408_s23 = smov 0   ;;  %s1410_s24 = smov 0  }
   0xd   :  { %s1412_s25 = smov 0   ;;  %s1414_s26 = smov 0  }
   0xe   :  { %s1416_s27 = smov 0   ;;  %s1418_s28 = smov 0  }
   0xf   :  { %s1420_s29 = smov 0   ;;  %s1422_s30 = smov 0  }
  0x10   :  { %s1424_s7 = smov 0   ;;  %s1426_s8 = smov 0  }
  0x11   :  { %s1428_s9 = smov 0  }
  0x12 LB: > { %1825 = sst [smem:[#allocation19_spill]] %s1307_s21  ;;  %s1468_s10 = sadd.s32 4294967295, %s1355_s9   ;;  %s1355_s9 = sphi %s1428_s9, %s28_s9   ;;  %s1351_s8 = sphi %s1426_s8, %s1867_s8   ;;  %s1347_s7 = sphi %s1424_s7, %s1859_s7   ;;  %s1343_s30 = sphi %s1422_s30, %s1858_s30   ;;  %s1339_s29 = sphi %s1420_s29, %s1857_s29   ;;  %s1335_s28 = sphi %s1418_s28, %s1784_s28   ;;  %s1331_s27 = sphi %s1416_s27, %s1866_s27   ;;  %s1327_s26 = sphi %s1414_s26, %s1865_s26   ;;  %s1323_s25 = sphi %s1412_s25, %s1864_s25   ;;  %s1319_s24 = sphi %s1410_s24, %s1863_s24   ;;  %s1315_s23 = sphi %s1408_s23, %s1855_s23   ;;  %s1311_s22 = sphi %s1406_s22, %s1862_s22   ;;  %s1307_s21 = sphi %s1404_s21, %s1861_s21  }
  0x13   : > { %1826 = sst [smem:[#allocation20_spill]] %s1315_s23  ;;  %s37_s12 = sadd.s32 1, %s1347_s7 }
  0x14   : > { %1827 = sst [smem:[#allocation21_spill]] %s1347_s7  ;;  %s40_s13 = sadd.s32 1, %s1351_s8 }
  0x15   : > { %1828 = sst [smem:[#allocation22_spill]] %s1351_s8  ;;  %p38_p0 = scmp.ge.s32.totalorder %s37_s12, 2 }
  0x16   : > { %s890_s14 = sshll.u32 %s1351_s8, 1  ;;  %p1304_p1 = scmp.ne.s32.totalorder %s1335_s28, 0 }
  0x17   : > { %s45_s15 = sadd.s32 %s1347_s7, %s890_s14  ;;  %s1869_s12 = smov (%p38_p0, %s37_s12), 0 }
  0x18   : > { %1829 = sst [smem:[#allocation23_spill]] %s1869_s12  ;;  %s1871_s13 = smov (!%p38_p0, %s40_s13), %s1351_s8 }
  0x19   : > { %p42_p2 = scmp.ge.s32.totalorder %s1871_s13, 2  ;;  %p63_p3 = scmp.eq.s32.totalorder %s1355_s9, 0 }
  0x1a   : > { %p68_p5 = scmp.ne.s32.totalorder %s1335_s28, %s1331_s27  ;;  %p69_p6 = scmp.eq.s32.totalorder %s1468_s10, 0 }
  0x1b   : > { %s1873_s13 = smov (%p42_p2, %s1871_s13), 0  ;;  %p1484_p4 = por %p1304_p1, %p63_p3 }
  0x1c   : > { %1830 = sst [smem:[#allocation24_spill]] %s1873_s13  ;;  %s891_s17 = sshll.u32 %s1873_s13, 1 }
  0x1d   : > { %s49_s18 = sadd.s32 %s891_s17, %s1869_s12  ;;  %p114_p7 = scmp.lt.s32.totalorder %s45_s15, 2 }
  0x1e   : > { %p1494_p8 = por %p69_p6, %p68_p5  ;;  %p118_p9 = scmp.lt.s32.totalorder %s49_s18, 2 }
  0x1f   : > { %s1875_s15 = smov (!%p114_p7, %s45_s15), 2  ;;  %s123_s20 = sadd.s32 1, %s1327_s26 }
  0x20   : > { %s1832_s19 = scalar_select %p1494_p8, 1, 0 }
  0x21   : > { %p130_p10 = scmp.ne.s32.totalorder %s1327_s26, %s1323_s25  ;;  %p136_p11 = scmp.ne.s32.totalorder %s1323_s25, %s1319_s24 }
  0x22   : > { %s1877_s18 = smov (!%p118_p9, %s49_s18), 2  ;;  %s248_s11 = ssub.s32 %s1351_s8, %s1873_s13 }
  0x23   : > { %s120_s27 = ssub.s32 %s1875_s15, %s1877_s18  ;;  %p1508_p12 = por %p130_p10, %p63_p3 }
  0x24   : > { %p121_p13 = scmp.eq.s32.totalorder %s120_s27, 0  ;;  %p1514_p0 = por %p136_p11, %p69_p6 }
  0x25   : > { %s251_s12 = sadd.s32 1, %s1315_s23  ;;  %p249_p1 = scmp.eq.s32.totalorder %s248_s11, 0 }
  0x26   : > { %s1834_s17 = scalar_select %p1514_p0, 1, 0 }
  0x27   : > { %s1522_s7 = scalar_select %p121_p13, %s1327_s26, %s123_s20  }
  0x28   : > { %p261_p2 = scmp.ne.s32.totalorder %s1315_s23, %s1311_s22  ;;  %p262_p5 = scmp.eq.s32.totalorder %s1468_s10, 3 }
  0x29   : > { %1835 = sst [smem:[#allocation25_spill]] %s1522_s7  ;;  %p267_p7 = scmp.ne.s32.totalorder %s1311_s22, %s1307_s21 }
  0x2a   : > { %s1530_s24 = scalar_select %p249_p1, %s1315_s23, %s251_s12  }
  0x2b   : > { %p1532_p3 = por %p262_p5, %p261_p2  ;;  %s1839_s27 = sadd.s32 4294967294, %s1355_s9  }
  0x2c   : > { %1836 = sst [smem:[#allocation26_spill]] %s1530_s24  ;;  %p268_p9 = scmp.eq.s32.totalorder %s1839_s27, 3 }
  0x2d   : > { %s1837_s18 = scalar_select %p1532_p3, 1, 0 }
  0x2e   : > { %p1538_p6 = por %p268_p9, %p267_p7  ;;  %p903_p10 = scmp.ge.s32.totalorder %s1355_s9, 4 }
  0x2f   : > { %1838 = sst [smem:[#allocation27_spill]] %s1837_s18  ;;  %s1357_s20 = smov (!%p903_p10), [#allocation5]  }
  0x30   : > { %s1840_s6 = scalar_select %p1538_p6, 1, 0 }
  0x31   : > { %284 = sbr.rel (%p903_p10) target bundleno = 159 (0x9f), region = 16  ;;  %s303_s11 = sshll.u32 (!%p903_p10), %s1357_s20, 4  ;;  %s304_s11 = int_to_ptr.vmem [resolvable:$true] %s303_s11 }
  0x32   : > { %1841 = sst [smem:[#allocation28_spill]] %s1840_s6  ;;  %s1098_s8 = scalar_lea.hbm (!%p903_p10), %s1802_s0, 256 }
  0x33   : > { %p1099_p11 = scmp.ne.s32.totalorder (!%p903_p10), %s1802_s0, %s1098_s8  ;;  %p1104_p2 = scmp.lt.s32.totalorder (!%p903_p10), %s1098_s8, %s1098_s8 }
  0x35   : > { %p1100_p13 = pnand (!%p903_p10), %p1099_p11, %p1484_p4 }
  0x37   : > { %p1101_p1 = pneg %p1100_p13 }
  0x39   : > { %p1106_p5 = pnand %p1104_p2, %p1101_p1 }
  0x3b   : > { %1109 = shalt.err (!%p1106_p5)
}
  0x3c   : > { %s1110_s27 = scalar_lea.vmem %s304_s11, 256  ;;  %s1116_s20 = scalar_lea.vmem %s304_s11, 512 }
  0x3d   : > { %p1111_p7 = scmp.ne.s32.totalorder %s304_s11, %s1110_s27  ;;  %p1117_p6 = scmp.lt.s32.totalorder %s304_s11, %s304_s11 }
  0x3e   : > { %p1118_p3 = scmp.lt.s32.totalorder %s1116_s20, %s1110_s27 }
  0x3f   : > { %p1112_p9 = pnand %p1111_p7, %p1484_p4 }
  0x40   : > { %p1119_p0 = por %p1118_p3, %p1117_p6 }
  0x41   : > { %p1113_p10 = pneg %p1112_p9 }
  0x43   : > { %p1120_p8 = pnand %p1119_p0, %p1113_p10 }
  0x45   : > { %1123 = shalt.err (!%p1120_p8)
}
  0x46   : > { %s1358_s7 = smov 128   ;;  %s1359_s13 = smov 8  }
  0x47   : > { %962 = dma.hbm_to_vmem [thread:$0]  (%p1484_p4), %s1802_s0, 256, %s304_s11, [#allocation6], %s1358_s7, %s1358_s7, %s1359_s13  }
  0x48   : > { %s313_s12 = sand.u32 1, %s1355_s9   ;;  %s1360_s23 = smov [#allocation8]  }
  0x49   : > { %s328_s6 = sshll.u32 %s1360_s23, 4  ;;  %s1559_s21 = scalar_lea.sflag [#allocation9], %s313_s12  ;;  %s329_s6 = int_to_ptr.vmem [resolvable:$true] %s328_s6 }
  0x4a   : > { %s1124_s18 = scalar_lea.hbm %s1803_s1, 256 }
  0x4b   : > { %p1125_p8 = scmp.ne.s32.totalorder %s1803_s1, %s1124_s18  ;;  %p1130_p6 = scmp.lt.s32.totalorder %s1124_s18, %s1124_s18 }
  0x4d   : > { %p1126_p0 = pnand %p1125_p8, %p1484_p4 }
  0x4f   : > { %p1127_p3 = pneg %p1126_p0 }
  0x51   : > { %p1132_p11 = pnand %p1130_p6, %p1127_p3 }
  0x53   : > { %1135 = shalt.err (!%p1132_p11)
}
  0x54   : > { %s1136_s11 = scalar_lea.vmem %s329_s6, 256  ;;  %s1142_s23 = scalar_lea.vmem %s329_s6, 512 }
  0x55   : > { %p1137_p13 = scmp.ne.s32.totalorder %s329_s6, %s1136_s11  ;;  %p1143_p5 = scmp.lt.s32.totalorder %s329_s6, %s329_s6 }
  0x56   : > { %p1144_p7 = scmp.lt.s32.totalorder %s1142_s23, %s1136_s11 }
  0x57   : > { %p1138_p1 = pnand %p1137_p13, %p1484_p4 }
  0x58   : > { %p1145_p9 = por %p1144_p7, %p1143_p5 }
  0x59   : > { %p1139_p2 = pneg %p1138_p1 }
  0x5b   : > { %p1146_p10 = pnand %p1145_p9, %p1139_p2 }
  0x5d   : > { %1149 = shalt.err (!%p1146_p10)
}
  0x5e   : > { %963 = dma.hbm_to_vmem [thread:$0]  (%p1484_p4), %s1803_s1, 256, %s329_s6, %s1559_s21, %s1358_s7, %s1358_s7, %s1359_s13  }
  0x5f   : > { %337 = sbr.rel (!%p1508_p12) target bundleno = 127 (0x7f), region = 28  ;;  %s340_s18 = sand.u32 (%p1508_p12), 1, %s1327_s26  }
  0x60   : > { %s914_s8 = sshll.u32 (%p1508_p12), %s1875_s15, 1  ;;  %s912_s24 = sshll.u32 (%p1508_p12), %s340_s18, 4 }
  0x61   : > { %s348_s12 = ssub.s32 (%p1508_p12), 5, %s914_s8  ;;  %s342_s20 = scalar_lea.vmem (%p1508_p12), [#allocation10], %s912_s24 }
  0x62   : > { %p349_p8 = scmp.lt.s32.totalorder (%p1508_p12), %s348_s12, 2 }
  0x64   : > { %s1879_s12 = smov (!%p349_p8, %s348_s12), 2 }
  0x65   : > { %s1581_s27 = sshll.u32 %s1879_s12, 7 }
  0x66   : > { %s353_s16 = ssub.s32 256, %s1581_s27 }
  0x67   : > { %354 = vsyncadd %s1559_s21, %s353_s16  ;;  %p916_p4 = scmp.ne.s32.totalorder %s1581_s27, 0  ;;  %s954_s6 = sshll.u32 %s1875_s15, 8 }
  0x68   : > { %s1590_s11 = scalar_lea.hbm %s1804_s2, %s954_s6  ;;  %s359_s23 = sshll.u32 %s342_s20, 4  ;;  %s1592_s23 = int_to_ptr.vmem [resolvable:$true] %s359_s23 }
  0x69   : > { %s1150_s4 = scalar_lea.hbm %s1590_s11, %s1581_s27  ;;  %s1154_s8 = scalar_lea.hbm %s1804_s2, 640 }
  0x6a   : > { %p1151_p0 = scmp.ne.s32.totalorder %s1590_s11, %s1150_s4  ;;  %p1156_p11 = scmp.lt.s32.totalorder %s1154_s8, %s1150_s4 }
  0x6c   : > { %p1152_p3 = pnand %p1151_p0, %p916_p4 }
  0x6e   : > { %p1153_p6 = pneg %p1152_p3 }
  0x70   : > { %p1158_p13 = pnand %p1156_p11, %p1153_p6 }
  0x72   : > { %1161 = shalt.err (!%p1158_p13)
}
  0x73   : > { %s1162_s24 = scalar_lea.vmem %s1592_s23, %s1581_s27  ;;  %s1361_s12 = smov [#allocation10]  }
  0x74   : > { %p1163_p1 = scmp.ne.s32.totalorder %s1592_s23, %s1162_s24  ;;  %s1166_s16 = sshll.u32 %s1361_s12, 4  ;;  %s1167_s16 = int_to_ptr.vmem [resolvable:$false] %s1166_s16 }
  0x75   : > { %s1168_s20 = scalar_lea.vmem %s1167_s16, 512  ;;  %p1169_p7 = scmp.lt.s32.totalorder %s1592_s23, %s1167_s16 }
  0x76   : > { %p1164_p2 = pnand %p1163_p1, %p916_p4  ;;  %p1170_p9 = scmp.lt.s32.totalorder %s1168_s20, %s1162_s24 }
  0x78   : > { %p1165_p5 = pneg %p1164_p2  ;;  %p1171_p10 = por %p1170_p9, %p1169_p7 }
  0x7a   : > { %p1172_p8 = pnand %p1171_p10, %p1165_p5 }
  0x7c   : > { %1175 = shalt.err (!%p1172_p8)
}
  0x7d   : > { %s1362_s6 = smov 128   ;;  %s1363_s7 = smov 8  }
  0x7e   : > { %365 = dma.hbm_to_vmem [thread:$0]  (%p916_p4), %s1590_s11, %s1581_s27, %s1592_s23, %s1559_s21, %s1362_s6, %s1362_s6, %s1363_s7  }
  0x7f PF: > { %368 = sbr.rel (!%p1508_p12) target bundleno = 159 (0x9f), region = 32  ;;  %s369_s13 = sand.u32 (%p1508_p12), 1, %s1327_s26  }
  0x80   : > { %s922_s4 = sshll.u32 (%p1508_p12), %s1875_s15, 1  ;;  %s920_s5 = sshll.u32 (%p1508_p12), %s369_s13, 4 }
  0x81   : > { %s379_s18 = ssub.s32 (%p1508_p12), 5, %s922_s4  ;;  %s1621_s12 = scalar_lea.sflag (%p1508_p12), [#allocation12], %s369_s13 }
  0x82   : > { %p380_p0 = scmp.lt.s32.totalorder (%p1508_p12), %s379_s18, 2  ;;  %s373_s21 = scalar_lea.vmem (%p1508_p12), [#allocation11], %s920_s5 }
  0x84   : > { %s1881_s18 = smov (!%p380_p0, %s379_s18), 2 }
  0x85   : > { %s1618_s8 = sshll.u32 %s1881_s18, 7 }
  0x86   : > { %s384_s24 = ssub.s32 256, %s1618_s8 }
  0x87   : > { %385 = vsyncadd %s1621_s12, %s384_s24  ;;  %p924_p12 = scmp.ne.s32.totalorder %s1618_s8, 0  ;;  %s955_s14 = sshll.u32 %s1875_s15, 8 }
  0x88   : > { %s1629_s23 = scalar_lea.hbm %s1805_s3, %s955_s14  ;;  %s390_s16 = sshll.u32 %s373_s21, 4  ;;  %s1631_s16 = int_to_ptr.vmem [resolvable:$true] %s390_s16 }
  0x89   : > { %s1176_s20 = scalar_lea.hbm %s1629_s23, %s1618_s8  ;;  %s1180_s13 = scalar_lea.hbm %s1805_s3, 640 }
  0x8a   : > { %p1177_p4 = scmp.ne.s32.totalorder %s1629_s23, %s1176_s20  ;;  %p1182_p11 = scmp.lt.s32.totalorder %s1180_s13, %s1176_s20 }
  0x8c   : > { %p1178_p3 = pnand %p1177_p4, %p924_p12 }
  0x8e   : > { %p1179_p6 = pneg %p1178_p3 }
  0x90   : > { %p1184_p13 = pnand %p1182_p11, %p1179_p6 }
  0x92   : > { %1187 = shalt.err (!%p1184_p13)
}
  0x93   : > { %s1188_s15 = scalar_lea.vmem %s1631_s16, %s1618_s8  ;;  %s1364_s4 = smov [#allocation11]  }
  0x94   : > { %p1189_p1 = scmp.ne.s32.totalorder %s1631_s16, %s1188_s15  ;;  %s1192_s5 = sshll.u32 %s1364_s4, 4  ;;  %s1193_s5 = int_to_ptr.vmem [resolvable:$false] %s1192_s5 }
  0x95   : > { %s1194_s18 = scalar_lea.vmem %s1193_s5, 512  ;;  %p1195_p7 = scmp.lt.s32.totalorder %s1631_s16, %s1193_s5 }
  0x96   : > { %p1190_p2 = pnand %p1189_p1, %p924_p12  ;;  %p1196_p9 = scmp.lt.s32.totalorder %s1194_s18, %s1188_s15 }
  0x98   : > { %p1191_p5 = pneg %p1190_p2  ;;  %p1197_p10 = por %p1196_p9, %p1195_p7 }
  0x9a   : > { %p1198_p8 = pnand %p1197_p10, %p1191_p5 }
  0x9c   : > { %1201 = shalt.err (!%p1198_p8)
}
  0x9d   : > { %s1365_s24 = smov 128   ;;  %s1366_s21 = smov 8  }
  0x9e   : > { %396 = dma.hbm_to_vmem [thread:$0]  (%p924_p12), %s1629_s23, %s1618_s8, %s1631_s16, %s1621_s12, %s1365_s24, %s1365_s24, %s1366_s21  }
  0x9f PF: > { %p928_p0 = scmp.ge.s32.totalorder %s1355_s9, 1  ;;  %p427_p4 = scmp.lt.s32.totalorder %s1355_s9, 5 }
  0xa1   : > { %p428_p3 = pnand %p928_p0, %p427_p4 }
  0xa2   : > { %s433_s14 = sand.u32 (!%p428_p3), 1, %s1335_s28   ;;  %p1842_p6 = scmp.ne.s32.totalorder (!%p428_p3), %s1832_s19, 0 }
  0xa3   : > { %431 = sbr.rel (%p428_p3) target bundleno = 529 (0x211), region = 44  ;;  %s1656_s27 = sshll.u32 (!%p428_p3), %s433_s14, 4 }
  0xa4   : > { %s434_s11 = scalar_lea.sflag (!%p428_p3), [#allocation6], %s433_s14  ;;  %s437_s20 = scalar_lea.vmem (!%p428_p3), [#allocation5], %s1656_s27 }
  0xa8   : > { %1285 = dma.done.wait (%p1842_p6), %s434_s11, 256  }
  0xa9   : > { %1287 = vsyncadd (%p1842_p6), %s434_s11, 4294967040  ;;  %s442_s8 = sand.u32 1, %s1468_s10   ;;  %s446_s23 = scalar_lea.vmem [#allocation8], %s1656_s27 }
  0xaa   : > { %s443_s12 = scalar_lea.sflag [#allocation9], %s442_s8 }
  0xab   : > { %1289 = dma.done.wait (%p1842_p6), %s443_s12, 256  }
  0xac   : > { %1291 = vsyncadd (%p1842_p6), %s443_s12, 4294967040  ;;  %s453_s16 = sand.u32 1, %s1323_s25   ;;  %p1843_p12 = scmp.ne.s32.totalorder %s1834_s17, 0 }
  0xad   : > { %s931_s6 = sshll.u32 %s453_s16, 4 }
  0xae   : > { %s1670_s7 = scalar_lea.vmem [#allocation10], %s931_s6 }
  0xaf   : > { %1293 = dma.done.wait (%p1843_p12), %s443_s12, 256  }
  0xb0   : > { %1295 = vsyncadd (%p1843_p12), %s443_s12, 4294967040  ;;  %s461_s10 = scalar_lea.sflag [#allocation12], %s453_s16  ;;  %s1676_s13 = scalar_lea.vmem [#allocation11], %s931_s6 }
  0xb1   : > { %1297 = dma.done.wait (%p1843_p12), %s461_s10, 256  }
  0xb2   : > { %1299 = vsyncadd (%p1843_p12), %s461_s10, 4294967040  ;;  %s520_s19 = sand.u32 1, %s1311_s22   ;;  %s933_s15 = sshll.u32 %s1343_s30, 1 }
  0xb3   : > { %s1685_s4 = sadd.s32 %s1339_s29, %s933_s15  ;;  %s1844_s21 = sld [smem:[#allocation30_spill]] }
  0xb4   : > { %p552_p11 = scmp.lt.s32.totalorder %s1685_s4, 0  ;;  %s1845_s12 = sld [smem:[#allocation29_spill]] }
  0xb5   : > { %s1703_s6 = scalar_lea.vmem [#allocation13], %s520_s19  ;;  %p943_p13 = scmp.ne.s32.totalorder %s1339_s29, 0 }
  0xb6   : > { %s553_s5 = scalar_select %p552_p11, %s1685_s4, 0 }
  0xb7   : > { %578 = sbr.rel (%p943_p13) target bundleno = 191 (0xbf), region = 64 }
  0xb8   : > { %s1883_s5 = smov (!%p552_p11, %s553_s5), 0 }
  0xb9   : > { %s937_s18 = sshll.u32 %s1883_s5, 1  ;;  %s568_s14 = scalar_lea.vmem %s1844_s21, %s1883_s5 }
  0xba   : > { %s1699_s16 = scalar_lea.vmem %s1845_s12, %s937_s18 }
  0xbc   : > { %v1367_v0 = vmov 0.0  }
  0xbd   : > { %579 = vst [vmem:[#allocation2] sm:$0xff] %v1367_v0  ;;  %580 = vst [vmem:[#allocation3] sm:$0xff] %v1367_v0 }
  0xbe   : > { %581 = vst [vmem:[#allocation4] sm:$0xff] %v1367_v0 }
  0xbf PF: > { %p944_p1 = scmp.ge.s32.totalorder %s1685_s4, 1 }
  0xc1   : > { %585 = sbr.rel (%p944_p1) target bundleno = 209 (0xd1), region = 68 }
  0xc6   : > { %v586_v1 = vld [vmem:[%s437_s20] sm:$0xff]  ;;  %v587_v2 = vld [vmem:[%s437_s20 + $0x8] sm:$0xff] }
  0xc7   : > { %v588_v3 = vld [vmem:[%s446_s23] sm:$0xff]  ;;  %v589_v4 = vld [vmem:[%s446_s23 + $0x8] sm:$0xff] }
  0xc8   : > { %v590_v5 = vsub.f32 %v586_v1, %v588_v3  ;;  %v591_v6 = vsub.f32 %v587_v2, %v589_v4  ;;  %v595_v9 = vld [vmem:[#allocation2] sm:$0xff] }
  0xca   : > { %v592_v7 = vmul.f32 %v590_v5, %v590_v5  ;;  %v593_v8 = vmul.f32 %v591_v6, %v591_v6 }
  0xcc   : > { %v594_v10 = vadd.f32 %v593_v8, %v592_v7 }
  0xce   : > { %v596_v11 = vadd.f32 %v595_v9, %v594_v10 }
  0xd0   : > { %597 = vst [vmem:[#allocation2] sm:$0xff] %v596_v11 }
  0xd1 PF: > { %p945_p2 = scmp.ge.s32.totalorder %s1685_s4, 2 }
  0xd3   : > { %601 = sbr.rel (%p945_p2) target bundleno = 227 (0xe3), region = 72 }
  0xd8   : > { %v602_v12 = vld [vmem:[%s1670_s7] sm:$0xff]  ;;  %v603_v13 = vld [vmem:[%s1670_s7 + $0x8] sm:$0xff] }
  0xd9   : > { %v604_v14 = vld [vmem:[%s1676_s13] sm:$0xff]  ;;  %v605_v15 = vld [vmem:[%s1676_s13 + $0x8] sm:$0xff] }
  0xda   : > { %v606_v16 = vsub.f32 %v602_v12, %v604_v14  ;;  %v607_v17 = vsub.f32 %v603_v13, %v605_v15  ;;  %v611_v20 = vld [vmem:[#allocation3] sm:$0xff] }
  0xdc   : > { %v608_v18 = vmul.f32 %v606_v16, %v606_v16  ;;  %v609_v19 = vmul.f32 %v607_v17, %v607_v17 }
  0xde   : > { %v610_v21 = vadd.f32 %v609_v19, %v608_v18 }
  0xe0   : > { %v612_v22 = vadd.f32 %v611_v20, %v610_v21 }
  0xe2   : > { %613 = vst [vmem:[#allocation3] sm:$0xff] %v612_v22 }
  0xe3 PF: > { %p946_p5 = scmp.ne.s32.totalorder %s1685_s4, 2 }
  0xe5   : > { %617 = sbr.rel (%p946_p5) target bundleno = 243 (0xf3), region = 76 }
  0xea   : > { %v625_v23 = vld [vmem:[%s1670_s7] sm:$0xff] }
  0xeb   : > { %v627_v24 = vld [vmem:[%s1676_s13] sm:$0xff] }
  0xec   : > { %v629_v25 = vsub.f32 %v625_v23, %v627_v24  ;;  %v636_v26 = vld [vmem:[#allocation3] sm:$0xff] }
  0xee   : > { %v633_v27 = vmul.f32 %v629_v25, %v629_v25 }
  0xf0   : > { %v637_v28 = vadd.f32 %v636_v26, %v633_v27 }
  0xf2   : > { %638 = vst [vmem:[#allocation3] sm:$0xff] %v637_v28 }
  0xf3 PF: > { %641 = sbr.rel (%p944_p1) target bundleno = 278 (0x116), region = 80 }
  0xf8   : > { %v642_v29 = vld [vmem:[%s1699_s16] sm:$0x3]  ;;  %v645_v32 = vld [vmem:[#allocation4] sm:$0x3] }
  0xf9   : > { %1094 = vlog2.f32 %v642_v29  ;;  %v648_v30 = vld [vmem:[%s568_s14] sm:$0x1] }
  0xfa   : > { %1096 = vlog2.f32 %v648_v30 }
 0x106   : > { %v1095_v31 = vpop.eup %1094 }
 0x107   : > { %v644_v33 = vmul.f32 0.6931472, %v1095_v31  ;;  %v1097_v35 = vpop.eup %1096 }
 0x108   : > { %v650_v36 = vmul.f32 0.6931472, %v1097_v35 }
 0x109   : > { %v646_v34 = vadd.f32 %v645_v32, %v644_v33 }
 0x10b   : > { %647 = vst [vmem:[#allocation4] sm:$0x3] %v646_v34 }
 0x112   : > { %v651_v37 = vld [vmem:[#allocation4] sm:$0x1] }
 0x113   : > { %v652_v38 = vadd.f32 %v651_v37, %v650_v36 }
 0x115   : > { %653 = vst [vmem:[#allocation4] sm:$0x1] %v652_v38 }
 0x116 PF: > { %p948_p7 = scmp.ne.s32.totalorder %s1339_s29, 1 }
 0x118   : > { %657 = sbr.rel (%p948_p7) target bundleno = 503 (0x1f7), region = 84 }
 0x11d   : > { %v658_v39 = vld [vmem:[#allocation2] sm:$0xff]  ;;  %v678_v40 = vld [vmem:[#allocation4] sm:$0xff]  ;;  %v668_v41 = vld [vmem:[#allocation3] sm:$0xff]  ;;  %v696_v63 = vlaneseq }
 0x11e   : > { %659 = vadd.xlane.f32.xlu0 %v658_v39  ;;  %679 = vadd.xlane.f32.xlu1 %v678_v40 }
 0x11f   : > { %v697_v0 = vand.u32 127, %v696_v63 }
 0x121   : > { %vm701_vm0 = vcmp.eq.s32.totalorder %v697_v0, 3  ;;  %vm700_vm1 = vcmp.eq.s32.totalorder %v697_v0, 2  ;;  %vm699_vm2 = vcmp.eq.s32.totalorder %v697_v0, 1  ;;  %vm698_vm3 = vcmp.eq.s32.totalorder %v697_v0, 0 }
 0x122   : > { %669 = vadd.xlane.f32.xlu0 %v668_v41 }
 0x1a7   : > { %v660_v42 = vpop.xlane.xlu0 %659  ;;  %v680_v43 = vpop.xlane.xlu1 %679 }
 0x1a8   : > { %v661_v44 = vrot.slane %v660_v42, 4  ;;  %v681_v45 = vrot.slane %v680_v43, 4 }
 0x1aa   : > { %v662_v46 = vadd.f32 %v661_v44, %v660_v42  ;;  %v682_v47 = vadd.f32 %v681_v45, %v680_v43 }
 0x1ab   : > { %v670_v48 = vpop.xlane.xlu0 %669 }
 0x1ac   : > { %v663_v49 = vrot.slane %v662_v46, 2  ;;  %v683_v50 = vrot.slane %v682_v47, 2  ;;  %v671_v51 = vrot.slane %v670_v48, 4 }
 0x1ae   : > { %v684_v52 = vadd.f32 %v683_v50, %v682_v47  ;;  %v672_v53 = vadd.f32 %v671_v51, %v670_v48  ;;  %v664_v54 = vadd.f32 %v663_v49, %v662_v46 }
 0x1b0   : > { %v673_v55 = vrot.slane %v672_v53, 2  ;;  %v665_v56 = vrot.slane %v664_v54, 1  ;;  %v685_v57 = vrot.slane %v684_v52, 1 }
 0x1b2   : > { %v674_v58 = vadd.f32 %v673_v55, %v672_v53  ;;  %v666_v59 = vadd.f32 %v665_v56, %v664_v54  ;;  %v686_v61 = vadd.f32 %v685_v57, %v684_v52 }
 0x1b4   : > { %956 = vpush %v666_v59  ;;  %v675_v60 = vrot.slane %v674_v58, 1 }
 0x1b6   : > { %v676_v62 = vadd.f32 %v675_v60, %v674_v58 }
 0x1b8   : > { %958 = vpush %v676_v62 }
 0x1b9   : > { %960 = vpush %v686_v61 }
 0x1e5   : > { %s957_s29 = spop %956 }
 0x1e6   : > { %s689_s7 = smul.f32 0.00048828125, %s957_s29 }
 0x1e8   : > { %s692_s15 = smul.f32 65025.0, %s689_s7  ;;  %v704_v3 = vstv %s689_s7 }
 0x1e9   : > { %s959_s10 = spop %958 }
 0x1ea   : > { %s690_s13 = smul.f32 0.0001953125, %s959_s10  ;;  %s961_s5 = spop %960 }
 0x1eb   : > { %s688_s24 = smul.f32 -0.0028177637, %s961_s5 }
 0x1ec   : > { %s691_s4 = smul.f32 390.15, %s690_s13  ;;  %v702_v1 = vstv %s690_s13 }
 0x1ed   : > { %v703_v2 = vsel %vm701_vm0, %v702_v1, 0.0  ;;  %v706_v5 = vstv %s688_s24 }
 0x1ee   : > { %s693_s18 = sadd.f32 %s692_s15, %s691_s4  ;;  %v705_v4 = vsel %vm700_vm1, %v704_v3, %v703_v2 }
 0x1ef   : > { %v707_v6 = vsel %vm699_vm2, %v706_v5, %v705_v4 }
 0x1f0   : > { %s694_s17 = smul.f32 0.01, %s693_s18 }
 0x1f2   : > { %s695_s21 = sadd.f32 %s694_s17, %s688_s24 }
 0x1f4   : > { %v708_v7 = vstv %s695_s21 }
 0x1f5   : > { %v709_v8 = vsel %vm698_vm3, %v708_v7, %v707_v6 }
 0x1f6   : > { %710 = vst [vmem:[%s1703_s6] sm:$0x1] %v709_v8 }
 0x1f7 PF: > { %s1847_s14 = sld [smem:[#allocation27_spill]]  ;;  %s949_s11 = sshll.u32 %s1343_s30, 4 }
 0x1f8   : > { %s1848_s16 = sld [smem:[#allocation31_spill]]  ;;  %s724_s20 = sshll.u32 %s1703_s6, 4  ;;  %s725_s20 = int_to_ptr.vmem [resolvable:$true] %s724_s20 }
 0x1f9   : > { %s712_s23 = scalar_lea.sflag [#allocation7], %s520_s19  ;;  %s1202_s29 = scalar_lea.vmem %s725_s20, 16 }
 0x1fa   : > { %p1203_p9 = scmp.ne.s32.totalorder %s725_s20, %s1202_s29  ;;  %s1368_s7 = smov [#allocation13]  }
 0x1fb   : > { %s1206_s10 = sshll.u32 %s1368_s7, 4  ;;  %s1207_s10 = int_to_ptr.vmem [resolvable:$false] %s1206_s10 }
 0x1fc   : > { %s1208_s13 = scalar_lea.vmem %s1207_s10, 32  ;;  %p1209_p4 = scmp.lt.s32.totalorder %s725_s20, %s1207_s10 }
 0x1fd   : > { %p1849_p10 = scmp.ne.s32.totalorder %s1847_s14, 0  ;;  %p1210_p3 = scmp.lt.s32.totalorder %s1208_s13, %s1202_s29 }
 0x1fe   : > { %s722_s27 = scalar_lea.hbm %s1848_s16, %s949_s11 }
 0x1ff   : > { %p1204_p8 = pnand %p1203_p9, %p1849_p10  ;;  %p1211_p6 = por %p1210_p3, %p1209_p4 }
 0x201   : > { %p1205_p0 = pneg %p1204_p8 }
 0x203   : > { %p1212_p12 = pnand %p1211_p6, %p1205_p0 }
 0x205   : > { %1215 = shalt.err (!%p1212_p12)
}
 0x206   : > { %s1216_s30 = scalar_lea.hbm %s722_s27, 16  ;;  %s1220_s15 = scalar_lea.hbm %s1848_s16, 32 }
 0x207   : > { %p1217_p11 = scmp.ne.s32.totalorder %s722_s27, %s1216_s30  ;;  %p1221_p2 = scmp.lt.s32.totalorder %s722_s27, %s1848_s16 }
 0x208   : > { %p1222_p5 = scmp.lt.s32.totalorder %s1220_s15, %s1216_s30 }
 0x209   : > { %p1218_p13 = pnand %p1217_p11, %p1849_p10 }
 0x20a   : > { %p1223_p7 = por %p1222_p5, %p1221_p2 }
 0x20b   : > { %p1219_p1 = pneg %p1218_p13 }
 0x20d   : > { %p1224_p9 = pnand %p1223_p7, %p1219_p1 }
 0x20f   : > { %1227 = shalt.err (!%p1224_p9)
}
 0x210   : > { %968 = dma.vmem_to_hbm [thread:$0]  (%p1849_p10), %s725_s20, 16, %s722_s27, %s712_s23  }
 0x211 PF: > { %s1850_s18 = sld [smem:[#allocation19_spill]]  ;;  %p974_p8 = scmp.ge.s32.totalorder %s1355_s9, 2 }
 0x212   : > { %s1851_s24 = sld [smem:[#allocation28_spill]] }
 0x217   : > { %s736_s17 = sand.u32 1, %s1850_s18  }
 0x218   : > { %p1852_p0 = scmp.ne.s32.totalorder %s1851_s24, 0  ;;  %s737_s21 = scalar_lea.sflag [#allocation7], %s736_s17 }
 0x21a   : > { %p971_p4 = pnand %p974_p8, %p1852_p0 }
 0x21c   : > { %p972_p3 = pneg %p971_p4 }
 0x21e   : > { %1301 = dma.done.wait (%p972_p3), %s737_s21, 16  }
 0x21f   : > { %1303 = vsyncadd (%p972_p3), %s737_s21, 4294967280  ;;  %s28_s9 = sadd.s32 1, %s1355_s9   ;;  %s1854_s14 = sld [smem:[#allocation20_spill]] }
 0x220   : > { %p1759_p6 = scmp.ge.s32.totalorder %s28_s9, 6   ;;  %s1855_s23 = sld [smem:[#allocation26_spill]] }
 0x221   : > { %s1856_s8 = sld [smem:[#allocation25_spill]]  ;;  %s1861_s21 = smov %s1311_s22 }
 0x222   : > { %s1857_s29 = sld [smem:[#allocation21_spill]]  ;;  %s1863_s24 = smov %s1323_s25 }
 0x223   : > { %s1858_s30 = sld [smem:[#allocation22_spill]]  ;;  %s1864_s25 = smov %s1327_s26 }
 0x224   : > { %s1859_s7 = sld [smem:[#allocation23_spill]]  ;;  %s1866_s27 = smov %s1335_s28 }
 0x225   : > { %s1860_s12 = sld [smem:[#allocation24_spill]]  ;;  %s1862_s22 = smov %s1854_s14 }
 0x226   : > { %s1784_s28 = smov 0  }
 0x227   : > { %s1865_s26 = smov %s1856_s8  ;;  %27 = sbr.rel (!%p1759_p6) target bundleno = 18 (0x12), region = 156 }
 0x22b   : > { %s1867_s8 = smov %s1860_s12 }
 0x22c   :  { %741 = vsyncpa [#allocation6], 1 }
 0x22d   :  { %743 = vsyncpa [#allocation6 + $0x1], 1 }
 0x22e   :  { %744 = vsyncpa [#allocation9], 1 }
 0x22f   :  { %746 = vsyncpa [#allocation9 + $0x1], 1 }
 0x230   :  { %747 = vsyncpa [#allocation12], 1 }
 0x231   :  { %749 = vsyncpa [#allocation12 + $0x1], 1 }
 0x232   :  { %750 = vsyncpa [#allocation7], 1 }
 0x233   :  { %752 = vsyncpa [#allocation7 + $0x1], 1 }

</bundles_post_ra>
